<compile_context>
chip_gen: v6e
topology: v6e:2x2x1
jax: 0.10.0
libtpu: 0.0.40
codegen_flags: <defaults>
</compile_context>

<pallas_src>
import jax
import jax.numpy as jnp
from jax.experimental import pallas as pl
from jax.experimental.pallas import tpu as pltpu


def _mlp_kernel(x_ref, w1t_ref, b1_ref, w2t_ref, b2_ref, out_ref):
    # Per N-tile: matmul (MXU) -> bias + relu (VPU, f32) -> matmul (MXU) ->
    # transpose to lane-dense (XLU) -> log_softmax (VPU/EUP/XLU, f32).
    x = x_ref[...]                                                    # (TN, D)

    h1 = jnp.dot(x, w1t_ref[...],
                 preferred_element_type=jnp.float32) + b1_ref[...]   # (TN, H) f32
    h1 = jnp.maximum(h1, 0.0)                                         # ReLU (f32)

    logits = jnp.dot(h1.astype(w2t_ref.dtype), w2t_ref[...],
                     preferred_element_type=jnp.float32) + b2_ref[...]  # (TN, C) f32

    # Transpose once so the class axis sits on sublanes and the batch axis is
    # lane-dense; all remaining elementwise/reduction work and the store are dense.
    lt = logits.T                                                      # (C, TN)

    # Numerically stable log_softmax over the class axis (axis=0 here), f32.
    m = jnp.max(lt, axis=0, keepdims=True)                            # (1, TN)
    shifted = lt - m
    lse = jnp.log(jnp.sum(jnp.exp(shifted), axis=0, keepdims=True))   # (1, TN)
    out_ref[...] = (shifted - lse).astype(out_ref.dtype)              # (C, TN)


def _round_up(v, m):
    return ((v + m - 1) // m) * m


def mlp_classifier_forward(x, w1, b1, w2, b2, *, block_n=4096,
                           mxu_dtype=jnp.bfloat16):
    """x: (N, D); w1: (H, D); b1: (H,); w2: (C, H); b2: (C,). Returns (N, C) f32.

    Weights/biases follow PyTorch nn.Linear convention; they are transposed and
    cast once here (outside the kernel) so the kernel sees MXU-friendly layouts:
    W1^T (D, H), W2^T (H, C) in `mxu_dtype`, biases as (1, out_features) f32 rows.
    """
    n, d = x.shape
    h = w1.shape[0]
    c = w2.shape[0]

    w1t = w1.T.astype(mxu_dtype)            # (D, H) one-time transpose, outside kernel
    w2t = w2.T.astype(mxu_dtype)            # (H, C)
    b1_2d = b1.reshape(1, h).astype(jnp.float32)
    b2_2d = b2.reshape(1, c).astype(jnp.float32)
    x_in = x.astype(mxu_dtype)

    # Tile the batch dim.
    #  * Small N: one full-batch tile (block == full dim, so no (8,128) constraint).
    #  * N > 512: at least two tiles (so v7x megacore sharding has work for both
    #    TensorCores), each a multiple of 128 so the transposed (C, TN) output block
    #    is lane-aligned and the bf16 x block is sublane-aligned. Rows are fully
    #    independent, so padded rows in a partial tail tile never affect valid rows
    #    (the out-block store is masked).
    if n <= 512:
        tn = n
    else:
        tn = _round_up(min(block_n, pl.cdiv(n, 2)), 128)
    grid = (pl.cdiv(n, tn),)

    out_cn = pl.pallas_call(
        _mlp_kernel,
        out_shape=jax.ShapeDtypeStruct((c, n), jnp.float32),
        grid=grid,
        in_specs=[
            pl.BlockSpec((tn, d), lambda i: (i, 0)),   # x: tiled along N
            pl.BlockSpec((d, h), lambda i: (0, 0)),    # W1^T: resident across tiles
            pl.BlockSpec((1, h), lambda i: (0, 0)),    # b1:   resident
            pl.BlockSpec((h, c), lambda i: (0, 0)),    # W2^T: resident
            pl.BlockSpec((1, c), lambda i: (0, 0)),    # b2:   resident
        ],
        out_specs=pl.BlockSpec((c, tn), lambda i: (0, i)),  # lane-dense (C, TN) slab
        compiler_params=pltpu.CompilerParams(
            dimension_semantics=("parallel",),          # N-tiles shard across TCs (v7x)
            vmem_limit_bytes=48 * 1024 * 1024,          # headroom for TN=4096 tiles
        ),
    )(x_in, w1t, b1_2d, w2t, b2_2d)

    # Back to the module's (N, C) layout; tiny XLA transpose outside the kernel.
    return out_cn.T


def _reference_forward(x, w1, b1, w2, b2):
    h1 = jnp.maximum(x @ w1.T + b1, 0.0)
    logits = h1 @ w2.T + b2
    return jax.nn.log_softmax(logits, axis=1)


if __name__ == "__main__":
    # Shapes consistent with the module: input_size=16, hidden_size=32, num_class=4.
    D, H, C = 16, 32, 4

    key = jax.random.PRNGKey(0)
    k1, k2, kb1, kb2, kx_small, kx_big = jax.random.split(key, 6)

    # Deterministic glorot-uniform-ish init (weights_init in DGCNN uses glorot uniform).
    lim1 = (6.0 / (D + H)) ** 0.5
    lim2 = (6.0 / (H + C)) ** 0.5
    w1 = jax.random.uniform(k1, (H, D), minval=-lim1, maxval=lim1, dtype=jnp.float32)
    w2 = jax.random.uniform(k2, (C, H), minval=-lim2, maxval=lim2, dtype=jnp.float32)
    b1 = jax.random.uniform(kb1, (H,), minval=-0.1, maxval=0.1, dtype=jnp.float32)
    b2 = jax.random.uniform(kb2, (C,), minval=-0.1, maxval=0.1, dtype=jnp.float32)

    # N=8: single-tile path. N=600: >=2 tiles with a masked partial tail tile.
    for N, kx in ((8, kx_small), (600, kx_big)):
        x = jax.random.normal(kx, (N, D), dtype=jnp.float32)
        ref = _reference_forward(x, w1, b1, w2, b2)

        # Exact-precision path (f32 MXU) — tight tolerance vs reference.
        out_f32 = jax.block_until_ready(
            mlp_classifier_forward(x, w1, b1, w2, b2, mxu_dtype=jnp.float32))
        assert out_f32.shape == (N, C)
        assert jnp.allclose(out_f32, ref, atol=1e-5, rtol=1e-5), "f32 mismatch"

        # Default fast path (bf16 MXU, f32 accumulate) — loosened tolerance.
        out_bf16 = jax.block_until_ready(
            mlp_classifier_forward(x, w1, b1, w2, b2))
        assert out_bf16.shape == (N, C)
        assert jnp.allclose(out_bf16, ref, atol=5e-2, rtol=5e-2), "bf16 mismatch"

    print("KERNEL_OK")
</pallas_src>

<mosaic_0001>
module attributes {stable_mosaic.version = 11 : i64} {
  func.func @_mlp_kernel(%arg0: i32, %arg1: memref<8x16xf32, #tpu.memory_space<vmem>>, %arg2: memref<16x32xf32, #tpu.memory_space<vmem>>, %arg3: memref<1x32xf32, #tpu.memory_space<vmem>>, %arg4: memref<32x4xf32, #tpu.memory_space<vmem>>, %arg5: memref<1x4xf32, #tpu.memory_space<vmem>>, %arg6: memref<4x8xf32, #tpu.memory_space<vmem>>) attributes {dimension_semantics = [#tpu.dimension_semantics<parallel>], iteration_bounds = array<i64: 1>, scalar_prefetch = 0 : i64, scratch_operands = 0 : i64, tpu.core_type = #tpu.core_type<tc>, window_params = [{transform_indices = @transform_0, window_bounds = array<i64: 8, 16>}, {pipeline_mode = #tpu.pipeline_mode<synchronous>, transform_indices = @transform_1, window_bounds = array<i64: 16, 32>}, {pipeline_mode = #tpu.pipeline_mode<synchronous>, transform_indices = @transform_2, window_bounds = array<i64: 1, 32>}, {pipeline_mode = #tpu.pipeline_mode<synchronous>, transform_indices = @transform_3, window_bounds = array<i64: 32, 4>}, {pipeline_mode = #tpu.pipeline_mode<synchronous>, transform_indices = @transform_4, window_bounds = array<i64: 1, 4>}, {transform_indices = @transform_5, window_bounds = array<i64: 4, 8>}]} {
    %c0 = arith.constant 0 : index
    %c0_0 = arith.constant 0 : index
    %0 = vector.load %arg1[%c0, %c0_0] : memref<8x16xf32, #tpu.memory_space<vmem>>, vector<8x16xf32>
    %c0_1 = arith.constant 0 : index
    %c0_2 = arith.constant 0 : index
    %1 = vector.load %arg2[%c0_1, %c0_2] : memref<16x32xf32, #tpu.memory_space<vmem>>, vector<16x32xf32>
    %cst = arith.constant dense<0.000000e+00> : vector<8x32xf32>
    %2 = tpu.matmul %0, %1, %cst {dimension_numbers = #tpu.dot_dimension_numbers<[1], [0], [0], [1], [0, 0, 1, 1], [], []>} : vector<8x16xf32>, vector<16x32xf32>, vector<8x32xf32> -> vector<8x32xf32>
    %c0_3 = arith.constant 0 : index
    %c0_4 = arith.constant 0 : index
    %3 = vector.load %arg3[%c0_3, %c0_4] : memref<1x32xf32, #tpu.memory_space<vmem>>, vector<1x32xf32>
    %4 = vector.broadcast %3 : vector<1x32xf32> to vector<8x32xf32>
    %5 = arith.addf %2, %4 : vector<8x32xf32>
    %cst_5 = arith.constant 0.000000e+00 : f32
    %6 = vector.broadcast %cst_5 : f32 to vector<8x32xf32>
    %7 = arith.maximumf %5, %6 : vector<8x32xf32>
    %c0_6 = arith.constant 0 : index
    %c0_7 = arith.constant 0 : index
    %8 = vector.load %arg4[%c0_6, %c0_7] : memref<32x4xf32, #tpu.memory_space<vmem>>, vector<32x4xf32>
    %cst_8 = arith.constant dense<0.000000e+00> : vector<8x4xf32>
    %9 = tpu.matmul %7, %8, %cst_8 {dimension_numbers = #tpu.dot_dimension_numbers<[1], [0], [0], [1], [0, 0, 1, 1], [], []>} : vector<8x32xf32>, vector<32x4xf32>, vector<8x4xf32> -> vector<8x4xf32>
    %c0_9 = arith.constant 0 : index
    %c0_10 = arith.constant 0 : index
    %10 = vector.load %arg5[%c0_9, %c0_10] : memref<1x4xf32, #tpu.memory_space<vmem>>, vector<1x4xf32>
    %11 = vector.broadcast %10 : vector<1x4xf32> to vector<8x4xf32>
    %12 = arith.addf %9, %11 : vector<8x4xf32>
    %13 = tpu.transpose %12, [1, 0] : vector<8x4xf32> -> vector<4x8xf32>
    %cst_11 = arith.constant dense<0xFF800000> : vector<8xf32>
    %14 = vector.multi_reduction <maximumf>, %13, %cst_11 [0] : vector<4x8xf32> to vector<8xf32>
    %15 = vector.shape_cast %14 : vector<8xf32> to vector<1x8xf32>
    %16 = vector.broadcast %15 : vector<1x8xf32> to vector<4x8xf32>
    %17 = arith.subf %13, %16 : vector<4x8xf32>
    %18 = math.exp %17 : vector<4x8xf32>
    %cst_12 = arith.constant dense<0.000000e+00> : vector<8xf32>
    %19 = vector.multi_reduction <add>, %18, %cst_12 [0] : vector<4x8xf32> to vector<8xf32>
    %20 = vector.shape_cast %19 : vector<8xf32> to vector<1x8xf32>
    %21 = math.log %20 : vector<1x8xf32>
    %22 = vector.broadcast %21 : vector<1x8xf32> to vector<4x8xf32>
    %23 = arith.subf %17, %22 : vector<4x8xf32>
    %c0_13 = arith.constant 0 : index
    %c0_14 = arith.constant 0 : index
    %24 = vector.load %arg6[%c0_13, %c0_14] : memref<4x8xf32, #tpu.memory_space<vmem>>, vector<4x8xf32>
    tpu.vector_store %arg6[%c0_13, %c0_14], %23 {strides = array<i32>} : memref<4x8xf32, #tpu.memory_space<vmem>>, vector<4x8xf32>,
    return
  }
  func.func @transform_0(%arg0: i32) -> (i32, i32) {
    %c0_i32 = arith.constant 0 : i32
    %c0_i32_0 = arith.constant 0 : i32
    return %arg0, %c0_i32 : i32, i32
  }
  func.func @transform_1(%arg0: i32) -> (i32, i32) {
    %c0_i32 = arith.constant 0 : i32
    %c0_i32_0 = arith.constant 0 : i32
    %c0_i32_1 = arith.constant 0 : i32
    return %c0_i32, %c0_i32_0 : i32, i32
  }
  func.func @transform_2(%arg0: i32) -> (i32, i32) {
    %c0_i32 = arith.constant 0 : i32
    %c0_i32_0 = arith.constant 0 : i32
    %c0_i32_1 = arith.constant 0 : i32
    return %c0_i32, %c0_i32_0 : i32, i32
  }
  func.func @transform_3(%arg0: i32) -> (i32, i32) {
    %c0_i32 = arith.constant 0 : i32
    %c0_i32_0 = arith.constant 0 : i32
    %c0_i32_1 = arith.constant 0 : i32
    return %c0_i32, %c0_i32_0 : i32, i32
  }
  func.func @transform_4(%arg0: i32) -> (i32, i32) {
    %c0_i32 = arith.constant 0 : i32
    %c0_i32_0 = arith.constant 0 : i32
    %c0_i32_1 = arith.constant 0 : i32
    return %c0_i32, %c0_i32_0 : i32, i32
  }
  func.func @transform_5(%arg0: i32) -> (i32, i32) {
    %c0_i32 = arith.constant 0 : i32
    %c0_i32_0 = arith.constant 0 : i32
    return %c0_i32, %arg0 : i32, i32
  }
}

</mosaic_0001>

<bundles_post_ra>
// kernel: tpu_custom_call.1
= control target key start
LH: loop header
LB: loop body
LE: loop exit
PB: predicated region body
PF: predicated region fallthrough
CT: control target
= control target key end

     0   :  { %v318_v1 = vmov 0.0   ;;  %vm319_vm0 = vmmov 0   ;;  %s384_s0 = inlined_call_operand.vmem [shape: f32[8,16], index: 0, kind: input, shape index: {}]   ;;  %s385_s1 = inlined_call_operand.vmem [shape: f32[16,32], index: 1, kind: input, shape index: {}]   ;;  %s386_s2 = inlined_call_operand.vmem [shape: f32[1,32], index: 2, kind: input, shape index: {}]   ;;  %s387_s3 = inlined_call_operand.vmem [shape: f32[32,4], index: 3, kind: input, shape index: {}]   ;;  %s388_s4 = inlined_call_operand.vmem [shape: f32[1,4], index: 4, kind: input, shape index: {}]   ;;  %s389_s5 = inlined_call_operand.hbm [shape: f32[4,8], index: 5, kind: output, shape index: {}]  }
   0x1   :  { %v23_v0 = vld [vmem:[%s385_s1 + $0x8] sm:$0xff]  ;;  %271 = vmatprep.subr.mxu0 %v318_v1  ;;  %v22_v2 = vld [vmem:[%s385_s1] sm:$0xff]  ;;  %275 = vmatprep.mubr.msk.f32.mxu0 %vm319_vm0, %v318_v1  ;;  %v109_v3 = vld [vmem:[%s387_s3 + $0x18] sm:$0xff] }
   0x2   :  { %10 = vsyncpa [#allocation3], 0  ;;  %272 = vmatpush3.msra.mxu0 %v23_v0  ;;  %v21_v4 = vld [vmem:[%s384_s0] sm:$0xff]  ;;  %vm31_vm1 = vcmask 130048   ;;  %278 = vmatprep.subr.mxu1 %v318_v1  ;;  %v108_v5 = vld [vmem:[%s387_s3 + $0x10] sm:$0xff]  ;;  %vm117_vm2 = vcmask 261120  }
   0x3   :  { %273 = vmatprep.subr.mxu0 %v318_v1  ;;  %279 = vmatpush3.msra.mxu1 %v109_v3  ;;  %v107_v6 = vld [vmem:[%s387_s3 + $0x8] sm:$0xff]  ;;  %v106_v7 = vld [vmem:[%s387_s3] sm:$0xff]  ;;  %vm223_vm3 = vcmask 60416  }
   0x4   :  { %274 = vmatpush3.msra.mxu0 %v22_v2  ;;  %280 = vmatprep.subr.mxu1 %v318_v1  ;;  %v259_v8 = vld [vmem:[%s386_s2] ss:$0 sm:$0xff]  ;;  %s320_s2 = smov [#allocation2]  }
   0x5   :  { %276 = vmatmul.mubr.msk.f32.vlgmr.msra.gmra.mxu0 %vm31_vm1, %v21_v4  ;;  %286 = vmatprep.mubr.msk.f32.mxu1 %vm319_vm0, %v318_v1  ;;  %v261_v13 = vld [vmem:[%s388_s4] ss:$0 sm:$0xff]  ;;  %s251_s3 = sshll.u32 %s320_s2, 4  ;;  %s252_s3 = int_to_ptr.vmem [resolvable:$true] %s251_s3 }
   0x6   :  { %281 = vmatpush3.msra.mxu1 %v108_v5  ;;  %s296_s4 = scalar_lea.vmem %s252_s3, 64  ;;  %p301_p1 = scmp.lt.s32.totalorder %s252_s3, %s252_s3 }
   0x7   :  { %282 = vmatprep.subr.mxu1 %v318_v1  ;;  %p297_p0 = scmp.ne.s32.totalorder %s252_s3, %s296_s4  ;;  %p302_p2 = scmp.lt.s32.totalorder %s296_s4, %s296_s4 }
   0x8   :  { %283 = vmatpush3.msra.mxu1 %v107_v6 }
   0x9   :  { %284 = vmatprep.subr.mxu1 %v318_v1  ;;  %p303_p3 = por %p302_p2, %p301_p1 }
   0xa   :  { %285 = vmatpush3.msra.mxu1 %v106_v7 }
   0xb   :  { %p304_p4 = pnand %p303_p3, %p297_p0 }
  0xc5   :  { %v101_v9 = vpop.f32.mrf.mxu0 }
  0xc6   :  { %v102_v10 = vadd.f32 %v259_v8, %v101_v9 }
  0xc7   :  { %v277_v11 = vpop.f32.mrf.mxu0 }
  0xc8   :  { %v105_v12 = vmax.f32 %v102_v10, 0.0 }
  0xca   :  { %287 = vmatmul.mubr.msk.f32.vlgmr.msra.gmra.mxu1 %vm117_vm2, %v105_v12 }
 0x18a   :  { %v187_v14 = vpop.f32.mrf.mxu1 }
 0x18b   :  { %v188_v15 = vadd.f32 %v261_v13, %v187_v14 }
 0x18c   :  { %v288_v16 = vpop.f32.mrf.mxu1 }
 0x18d   :  { %191 = vxpose.xlu0.b32.start.end [1/1] (short) (narrow) %v188_v15, 8 }
 0x209   :  { %v207_v17 = vpop.trf.xlu0 }
 0x20a   :  { %v224_v18 = vsel %vm223_vm3, %v207_v17, -inf }
 0x20b   :  { %v225_v19 = vrot.slane %v224_v18, 4 }
 0x20d   :  { %v226_v20 = vmax.f32 %v224_v18, %v225_v19 }
 0x20f   :  { %v227_v21 = vrot.slane %v226_v20, 2 }
 0x211   :  { %v228_v22 = vmax.f32 %v226_v20, %v227_v21 }
 0x213   :  { %v229_v23 = vrot.slane %v228_v22, 1 }
 0x215   :  { %v230_v24 = vmax.f32 %v228_v22, %v229_v23 }
 0x217   :  { %v231_v25 = vsub.f32 %v207_v17, %v230_v24 }
 0x219   :  { %v232_v26 = vmul.f32 1.442695, %v231_v25 }
 0x21b   :  { %292 = vpow2.f32 %v232_v26 }
 0x228   :  { %v293_v27 = vpop.eup %292 }
 0x229   :  { %v234_v28 = vsel %vm223_vm3, %v293_v27, 0.0 }
 0x22a   :  { %v235_v29 = vrot.slane %v234_v28, 4 }
 0x22c   :  { %v236_v30 = vadd.f32 %v235_v29, %v234_v28 }
 0x22e   :  { %v237_v31 = vrot.slane %v236_v30, 2 }
 0x230   :  { %v238_v32 = vadd.f32 %v237_v31, %v236_v30 }
 0x232   :  { %v239_v33 = vrot.slane %v238_v32, 1 }
 0x234   :  { %v240_v34 = vadd.f32 %v239_v33, %v238_v32 }
 0x236   :  { %294 = vlog2.f32 %v240_v34 }
 0x243   :  { %v295_v35 = vpop.eup %294 }
 0x244   :  { %v242_v36 = vmul.f32 0.6931472, %v295_v35 }
 0x246   :  { %v243_v37 = vsub.f32 %v231_v25, %v242_v36 }
 0x248   :  { %244 = vst.msk [vmem:[#allocation2] sm:$0xf] %vm223_vm3, %v243_v37 }
 0x249   :  { %307 = shalt.err (!%p304_p4)
}
 0x24a   :  { %254 = dma.vmem_to_hbm [thread:$0]  %s252_s3, 64, %s389_s5, [#allocation3]  }
 0x24b   :  { %316 = dma.done.wait [#allocation3], 64  }
 0x24c   :  { %317 = vsyncadd [#allocation3], 4294967232 }
 0x24d   :  { %258 = vsyncpa [#allocation3], 1 }

</bundles_post_ra>
